<compile_context>
chip_gen: v5e
topology: v5e:2x2
jax: 0.10.0
libtpu: 0.0.40
codegen_flags: <defaults>
</compile_context>

<pallas_src>
import jax
import jax.numpy as jnp
import numpy as np
from jax.experimental import pallas as pl
from jax.experimental.pallas import tpu as pltpu

# ----------------------------- configuration ------------------------------
VOCAB_SIZE = 50
EMBEDDING_DIM = 32          # must equal ENCODE_DIM (reference index_copies embeddings
ENCODE_DIM = 32             # into an encode_dim buffer before W_c)
RNN_HIDDEN_DIM = 32
DECODE_DIM = 16

GATE_PAD = ((3 * RNN_HIDDEN_DIM + 127) // 128) * 128   # per-direction lane group (128)
TIME_CHUNK = 64                                        # bi-GRU time-chunk (v7x VMEM safe)
UNROLL = 4                                             # partial unroll of the recurrence


def _round_up(v, m):
    return ((v + m - 1) // m) * m


# ----------------------------- Pallas kernels -----------------------------
def _linear_kernel(x_ref, w_ref, b_ref, o_ref):
    o_ref[...] = (jnp.dot(x_ref[...], w_ref[...],
                          preferred_element_type=jnp.float32)
                  + b_ref[...]).astype(o_ref.dtype)


def pallas_linear(x, w_t, b, tm=512):
    """(M,K) @ (K,N) + b, tiled and pipelined over M."""
    M, K = x.shape
    N = w_t.shape[1]
    tm = min(tm, _round_up(M, 8))
    M_pad = _round_up(M, tm)
    if M_pad != M:
        x = jnp.concatenate([x, jnp.zeros((M_pad - M, K), x.dtype)], axis=0)
    out = pl.pallas_call(
        _linear_kernel,
        grid=(M_pad // tm,),
        in_specs=[pl.BlockSpec((tm, K), lambda i: (i, 0)),
                  pl.BlockSpec((K, N), lambda i: (0, 0)),
                  pl.BlockSpec((1, N), lambda i: (0, 0))],
        out_specs=pl.BlockSpec((tm, N), lambda i: (i, 0)),
        out_shape=jax.ShapeDtypeStruct((M_pad, N), jnp.float32),
        compiler_params=pltpu.CompilerParams(dimension_semantics=("parallel",)),
    )(x, w_t, b)
    return out[:M] if M_pad != M else out


def _max_reduce_kernel(x_ref, o_ref):
    blk = jnp.max(x_ref[...], axis=0)          # (N, E)

    @pl.when(pl.program_id(0) == 0)
    def _():
        o_ref[...] = blk

    @pl.when(pl.program_id(0) != 0)
    def _():
        o_ref[...] = jnp.maximum(o_ref[...], blk)


def pallas_max_over_levels(stack, tile_l=128):
    """torch.max(stack, 0)[0]: tiled over the level axis, resident accumulator."""
    L, N, E = stack.shape
    if L <= tile_l:
        tile_l = L                               # single block, no padding needed
        n_tiles = 1
    else:
        n_tiles = pl.cdiv(L, tile_l)
        L_pad = n_tiles * tile_l
        if L_pad != L:                           # rare ragged tail
            stack = jnp.concatenate(
                [stack, jnp.full((L_pad - L, N, E), -jnp.inf, stack.dtype)], axis=0)
    return pl.pallas_call(
        _max_reduce_kernel,
        grid=(n_tiles,),
        in_specs=[pl.BlockSpec((tile_l, N, E), lambda i: (i, 0, 0))],
        out_specs=pl.BlockSpec((N, E), lambda i: (0, 0)),
        out_shape=jax.ShapeDtypeStruct((N, E), jnp.float32),
        compiler_params=pltpu.CompilerParams(dimension_semantics=("arbitrary",)),
    )(stack)


def _make_bigru_fc_kernel(tT, H, GPAD, unroll):
    """Fused bidirectional GRU chunk + fc/tanh epilogue.

    Per grid step (time chunk): forward direction consumes chunk c in ascending time,
    backward direction consumes chunk C-1-c in descending time.  Both hidden states
    live concatenated in one (B, 2H) VMEM scratch that persists across chunks.
    gi*_ref blocks are per-direction, 128-lane padded (lanes [0:3H] valid).
    One block-diagonal h@W_hh MXU op per step.  PyTorch gate order (r, z, n).
    pack_padded_sequence semantics via the (B,1) float mask (reference FRONT-pads and
    then packs with src_lens, i.e. it keeps the leading zero-pad steps - reproduced)."""
    n_steps = tT // unroll

    def kernel(gif_ref, gib_ref, mf_ref, mb_ref, whh_ref, bhh_ref,
               fcw_ref, fcb_ref, out_f_ref, out_b_ref, hid_ref, h_scr):
        @pl.when(pl.program_id(0) == 0)
        def _():
            h_scr[...] = jnp.zeros_like(h_scr)

        whh = whh_ref[...]          # (2H, 2*GPAD) block-diagonal [fwd | bwd]
        bhh = bhh_ref[...]          # (1, 2*GPAD)

        def one_step(i):
            ib = tT - 1 - i
            h = h_scr[...]                          # (B, 2H) = [h_f | h_b]
            h_f = h[:, 0:H]
            h_b = h[:, H:2 * H]

            gh = jnp.dot(h, whh, preferred_element_type=jnp.float32) + bhh
            gh_f = gh[:, 0:GPAD]
            gh_b = gh[:, GPAD:2 * GPAD]

            gif = gif_ref[i]                        # (B, GPAD)
            gib = gib_ref[ib]                       # (B, GPAD)
            mf = mf_ref[i]                          # (B, 1)
            mb = mb_ref[ib]

            r_f = jax.nn.sigmoid(gif[:, 0:H] + gh_f[:, 0:H])
            z_f = jax.nn.sigmoid(gif[:, H:2 * H] + gh_f[:, H:2 * H])
            n_f = jnp.tanh(gif[:, 2 * H:3 * H] + r_f * gh_f[:, 2 * H:3 * H])
            hf_new = (1.0 - z_f) * n_f + z_f * h_f

            r_b = jax.nn.sigmoid(gib[:, 0:H] + gh_b[:, 0:H])
            z_b = jax.nn.sigmoid(gib[:, H:2 * H] + gh_b[:, H:2 * H])
            n_b = jnp.tanh(gib[:, 2 * H:3 * H] + r_b * gh_b[:, 2 * H:3 * H])
            hb_new = (1.0 - z_b) * n_b + z_b * h_b

            out_f_ref[i] = (mf * hf_new).astype(out_f_ref.dtype)
            out_b_ref[ib] = (mb * hb_new).astype(out_b_ref.dtype)
            # masked state update, single concatenated store
            h_scr[...] = jnp.concatenate(
                [h_f + mf * (hf_new - h_f), h_b + mb * (hb_new - h_b)], axis=-1)

        @pl.loop(0, n_steps)
        def _(k):
            base = k * unroll
            for u in range(unroll):                 # partial unroll inside the chunk
                one_step(base + u)

        # fused fc + tanh on the (resident) final hidden states; only the last
        # chunk's value survives in the resident output block.
        hcat = h_scr[...]                           # (B, 2H) = [h_f_final | h_b_final]
        hid_ref[...] = jnp.tanh(
            jnp.dot(hcat, fcw_ref[...], preferred_element_type=jnp.float32)
            + fcb_ref[...]).astype(hid_ref.dtype)

    return kernel


def pallas_bigru_fc(gi, mask, params, tT):
    """gi: (T_pad, B, 2*GPAD), mask: (T_pad, B, 1).  Returns (out_f, out_b, hidden)."""
    T_pad, B, W = gi.shape
    H = RNN_HIDDEN_DIM
    GPAD = GATE_PAD
    DEC = DECODE_DIM
    C = T_pad // tT
    kernel = _make_bigru_fc_kernel(tT, H, GPAD, UNROLL)

    out_f, out_b, hidden = pl.pallas_call(
        kernel,
        grid=(C,),
        in_specs=[
            # forward-direction lanes of chunk c / backward-direction lanes of chunk C-1-c
            pl.BlockSpec((tT, B, GPAD), lambda c: (c, 0, 0)),
            pl.BlockSpec((tT, B, GPAD), lambda c: (C - 1 - c, 0, 1)),
            pl.BlockSpec((tT, B, 1), lambda c: (c, 0, 0)),
            pl.BlockSpec((tT, B, 1), lambda c: (C - 1 - c, 0, 0)),
            pl.BlockSpec((2 * H, 2 * GPAD), lambda c: (0, 0)),
            pl.BlockSpec((1, 2 * GPAD), lambda c: (0, 0)),
            pl.BlockSpec((2 * H, DEC), lambda c: (0, 0)),
            pl.BlockSpec((1, DEC), lambda c: (0, 0)),
        ],
        out_specs=[
            pl.BlockSpec((tT, B, H), lambda c: (c, 0, 0)),
            pl.BlockSpec((tT, B, H), lambda c: (C - 1 - c, 0, 0)),
            pl.BlockSpec((B, DEC), lambda c: (0, 0)),
        ],
        out_shape=[
            jax.ShapeDtypeStruct((T_pad, B, H), jnp.float32),
            jax.ShapeDtypeStruct((T_pad, B, H), jnp.float32),
            jax.ShapeDtypeStruct((B, DEC), jnp.float32),
        ],
        scratch_shapes=[pltpu.VMEM((B, 2 * H), jnp.float32)],
        compiler_params=pltpu.CompilerParams(dimension_semantics=("arbitrary",)),
    )(gi, gi, mask, mask, params['whh_block'], params['bhh_pad'],
      params['fc_w_t'], params['fc_b'])
    return out_f, out_b, hidden


# ------------------------- BatchTreeEncoder (glue) -------------------------
def _build_tree_plan(nodes):
    """Host-only structural pass mirroring traverse_mul.  One 'slot' per non-stop node
    occurrence (slot id == position in the flat token list).  Returns flat int plans."""
    tokens, slot_row, slot_level, parent = [], [], [], []
    n_levels = 0

    def walk(node, batch_index, parent_slots):
        nonlocal n_levels
        size = len(node)
        if not size:
            return
        level = n_levels
        n_levels += 1
        slot_of_local = {}
        children, children_index = [], []
        for i in range(size):
            if node[i][0] != -1:
                s = len(tokens)
                tokens.append(int(node[i][0]))
                slot_row.append(batch_index[i])
                slot_level.append(level)
                parent.append(parent_slots[i] if parent_slots is not None else -1)
                slot_of_local[i] = s
                temp = node[i][1:]
                for j in range(len(temp)):
                    if temp[j][0] != -1:
                        if len(children_index) <= j:
                            children_index.append([i])
                            children.append([temp[j]])
                        else:
                            children_index[j].append(i)
                            children[j].append(temp[j])
            # else: stop (-1) node.  Its row is dropped from b_in in the reference,
            # so its value never reaches the output; it produces no slot here.
        for c in range(len(children)):
            walk(children[c],
                 [batch_index[i] for i in children_index[c]],
                 [slot_of_local[i] for i in children_index[c]])

    walk(nodes, list(range(len(nodes))), None)
    return tokens, slot_row, slot_level, parent, n_levels


def batch_tree_encode(params, nodes, bs):
    """Closed form of the reference's cumulative in-loop W_c: every non-stop row ends
    up as exactly ONE W_c(embedding[token]) (the last index_copy overwrites it before
    the final W_c).  Each traverse_mul call's batch_current row equals the sum of
    W_c(embedding) over its slot-subtree -> one gather + one segment_sum."""
    tokens, slot_row, slot_level, parent, n_levels = _build_tree_plan(nodes)
    if not tokens or n_levels == 0:
        return jnp.zeros((bs, ENCODE_DIM), jnp.float32)

    n_slots = len(tokens)
    pair_src, pair_dst = [], []              # token slot -> ancestor-or-self slot
    for s in range(n_slots):
        a = s
        while a != -1:
            pair_src.append(s)
            pair_dst.append(a)
            a = parent[a]

    # ONE embedding gather + ONE tiled W_c matmul for every node of every level.
    emb = params['embedding'][jnp.asarray(tokens, jnp.int32)]           # (S, E)
    wc_nodes = pallas_linear(emb, params['wc_t'], params['wc_b'])       # (S, E)

    vals = wc_nodes[jnp.asarray(pair_src, jnp.int32)]                   # (P, E)
    bc = jax.ops.segment_sum(vals, jnp.asarray(pair_dst, jnp.int32),
                             num_segments=n_slots)                      # (S, E)

    # node_list stack via a single scatter (level l is zeros outside its rows).
    stack = jnp.zeros((n_levels, bs, ENCODE_DIM), jnp.float32)
    stack = stack.at[jnp.asarray(slot_level, jnp.int32),
                     jnp.asarray(slot_row, jnp.int32)].set(bc)
    return pallas_max_over_levels(stack)                                # torch.max(., 0)[0]


# ------------------------------ Encoder forward -----------------------------
def _build_padded_time_major(encodes_all, src_lens, T, T_pad):
    """Reference FRONT-pads each sequence with zeros; build the padded batch with a
    single gather, time-major flattened: row (t*B + b) = encodes[b, t - pad_b]."""
    B = len(src_lens)
    total = int(encodes_all.shape[0])
    idx = np.full((T_pad, B), total, dtype=np.int32)     # `total` -> appended zero row
    off = 0
    for b, lb in enumerate(src_lens):
        pad = T - lb
        idx[pad:pad + lb, b] = np.arange(off, off + lb, dtype=np.int32)
        off += lb
    src = jnp.concatenate(
        [encodes_all, jnp.zeros((1, ENCODE_DIM), jnp.float32)], axis=0)
    return src[jnp.asarray(idx.reshape(-1))]             # (T_pad*B, E)


def encoder_forward(params, x):
    src_lens = [len(item) for item in x]
    batch_size = len(x)
    max_len = max(src_lens)
    GPAD = GATE_PAD

    encodes_in = []
    for i in range(batch_size):
        for j in range(src_lens[i]):
            encodes_in.append(x[i][j])
    encodes_all = batch_tree_encode(params, encodes_in, sum(src_lens))

    # time chunking (bounds VMEM, restores pipelining on long sequences)
    tT = min(TIME_CHUNK, _round_up(max_len, UNROLL))
    T_pad = _round_up(max_len, tT)

    x_tm_flat = _build_padded_time_major(encodes_all, src_lens, max_len, T_pad)

    # Input projections for BOTH GRU directions as one tiled matmul (lane-padded).
    gi = pallas_linear(x_tm_flat, params['wih_t_pad'], params['bih_pad'])
    gi = gi.reshape(T_pad, batch_size, 2 * GPAD)

    # pack_padded_sequence semantics: keep the first len[b] timesteps of each
    # (front-padded) row -> mask[t, b] = t < len[b] (reference quirk preserved).
    lens = jnp.asarray(src_lens, jnp.int32)
    mask = (jnp.arange(T_pad, dtype=jnp.int32)[:, None] < lens[None, :]
            ).astype(jnp.float32)[:, :, None]            # (T_pad, B, 1)

    out_f, out_b, hidden = pallas_bigru_fc(gi, mask, params, tT)
    outputs = jnp.concatenate([out_f[:max_len], out_b[:max_len]], axis=-1)  # (T, B, 2H)
    outputs = jnp.transpose(outputs, (1, 0, 2))          # batch_first=True
    # self.dropout is defined in __init__ but never applied in forward().
    return outputs, hidden, src_lens


# ------------------------------- parameters --------------------------------
def init_params(key):
    ks = jax.random.split(key, 13)
    s = 0.1
    H = RNN_HIDDEN_DIM
    GPAD = GATE_PAD
    p = {}
    p['embedding'] = jax.random.normal(ks[0], (VOCAB_SIZE, EMBEDDING_DIM), jnp.float32) * s
    wc = jax.random.normal(ks[1], (ENCODE_DIM, EMBEDDING_DIM), jnp.float32) * s
    p['wc_t'] = wc.T
    p['wc_b'] = (jax.random.normal(ks[2], (ENCODE_DIM,), jnp.float32) * s).reshape(1, -1)

    wih_pad = jnp.zeros((ENCODE_DIM, 2 * GPAD), jnp.float32)
    bih_pad = jnp.zeros((1, 2 * GPAD), jnp.float32)
    whh_blk = jnp.zeros((2 * H, 2 * GPAD), jnp.float32)      # block-diagonal, lane-padded
    bhh_pad = jnp.zeros((1, 2 * GPAD), jnp.float32)
    for d in range(2):                                       # 0 = fwd, 1 = bwd
        base = 3 + d * 4
        wih = jax.random.normal(ks[base], (3 * H, ENCODE_DIM), jnp.float32) * s
        whh = jax.random.normal(ks[base + 1], (3 * H, H), jnp.float32) * s
        bih = jax.random.normal(ks[base + 2], (3 * H,), jnp.float32) * s
        bhh = jax.random.normal(ks[base + 3], (3 * H,), jnp.float32) * s
        lo = d * GPAD
        wih_pad = wih_pad.at[:, lo:lo + 3 * H].set(wih.T)
        bih_pad = bih_pad.at[0, lo:lo + 3 * H].set(bih)
        whh_blk = whh_blk.at[d * H:(d + 1) * H, lo:lo + 3 * H].set(whh.T)
        bhh_pad = bhh_pad.at[0, lo:lo + 3 * H].set(bhh)
    p['wih_t_pad'] = wih_pad
    p['bih_pad'] = bih_pad
    p['whh_block'] = whh_blk
    p['bhh_pad'] = bhh_pad

    fcw = jax.random.normal(ks[11], (DECODE_DIM, 2 * H), jnp.float32) * s
    p['fc_w_t'] = fcw.T
    p['fc_b'] = (jax.random.normal(ks[12], (DECODE_DIM,), jnp.float32) * s).reshape(1, -1)
    return p


# ----------------------------------- main -----------------------------------
if __name__ == "__main__":
    key = jax.random.PRNGKey(0)
    params = init_params(key)

    def make_tree(tok, depth):
        tok = int(tok) % (VOCAB_SIZE - 1)
        if depth == 0:
            return [tok]
        return [tok, make_tree(tok * 3 + 1, depth - 1), make_tree(tok * 5 + 2, depth - 1)]

    # batch of 2 "programs": 3 and 2 statement trees respectively
    x = [
        [make_tree(1, 2), make_tree(2, 1), make_tree(3, 1)],
        [make_tree(4, 1), make_tree(5, 2)],
    ]

    outputs, hidden, src_lens = encoder_forward(params, x)
    jax.block_until_ready(outputs)
    jax.block_until_ready(hidden)

    assert outputs.shape == (2, 3, 2 * RNN_HIDDEN_DIM)
    assert hidden.shape == (2, DECODE_DIM)
    assert src_lens == [3, 2]
    print("KERNEL_OK")
</pallas_src>

<mosaic_0001>
module attributes {stable_mosaic.version = 11 : i64} {
  func.func @_linear_kernel(%arg0: i32, %arg1: memref<24x32xf32, #tpu.memory_space<vmem>>, %arg2: memref<32x32xf32, #tpu.memory_space<vmem>>, %arg3: memref<1x32xf32, #tpu.memory_space<vmem>>, %arg4: memref<24x32xf32, #tpu.memory_space<vmem>>) attributes {dimension_semantics = [#tpu.dimension_semantics<parallel>], iteration_bounds = array<i64: 1>, scalar_prefetch = 0 : i64, scratch_operands = 0 : i64, tpu.core_type = #tpu.core_type<tc>, window_params = [{transform_indices = @transform_0, window_bounds = array<i64: 24, 32>}, {pipeline_mode = #tpu.pipeline_mode<synchronous>, transform_indices = @transform_1, window_bounds = array<i64: 32, 32>}, {pipeline_mode = #tpu.pipeline_mode<synchronous>, transform_indices = @transform_2, window_bounds = array<i64: 1, 32>}, {transform_indices = @transform_3, window_bounds = array<i64: 24, 32>}]} {
    %c0 = arith.constant 0 : index
    %c0_0 = arith.constant 0 : index
    %0 = vector.load %arg1[%c0, %c0_0] : memref<24x32xf32, #tpu.memory_space<vmem>>, vector<24x32xf32>
    %c0_1 = arith.constant 0 : index
    %c0_2 = arith.constant 0 : index
    %1 = vector.load %arg2[%c0_1, %c0_2] : memref<32x32xf32, #tpu.memory_space<vmem>>, vector<32x32xf32>
    %cst = arith.constant dense<0.000000e+00> : vector<24x32xf32>
    %2 = tpu.matmul %0, %1, %cst {dimension_numbers = #tpu.dot_dimension_numbers<[1], [0], [0], [1], [0, 0, 1, 1], [], []>} : vector<24x32xf32>, vector<32x32xf32>, vector<24x32xf32> -> vector<24x32xf32>
    %c0_3 = arith.constant 0 : index
    %c0_4 = arith.constant 0 : index
    %3 = vector.load %arg3[%c0_3, %c0_4] : memref<1x32xf32, #tpu.memory_space<vmem>>, vector<1x32xf32>
    %4 = vector.broadcast %3 : vector<1x32xf32> to vector<24x32xf32>
    %5 = arith.addf %2, %4 : vector<24x32xf32>
    %c0_5 = arith.constant 0 : index
    %c0_6 = arith.constant 0 : index
    %6 = vector.load %arg4[%c0_5, %c0_6] : memref<24x32xf32, #tpu.memory_space<vmem>>, vector<24x32xf32>
    tpu.vector_store %arg4[%c0_5, %c0_6], %5 {strides = array<i32>} : memref<24x32xf32, #tpu.memory_space<vmem>>, vector<24x32xf32>,
    return
  }
  func.func @transform_0(%arg0: i32) -> (i32, i32) {
    %c0_i32 = arith.constant 0 : i32
    %c0_i32_0 = arith.constant 0 : i32
    return %arg0, %c0_i32 : i32, i32
  }
  func.func @transform_1(%arg0: i32) -> (i32, i32) {
    %c0_i32 = arith.constant 0 : i32
    %c0_i32_0 = arith.constant 0 : i32
    %c0_i32_1 = arith.constant 0 : i32
    return %c0_i32, %c0_i32_0 : i32, i32
  }
  func.func @transform_2(%arg0: i32) -> (i32, i32) {
    %c0_i32 = arith.constant 0 : i32
    %c0_i32_0 = arith.constant 0 : i32
    %c0_i32_1 = arith.constant 0 : i32
    return %c0_i32, %c0_i32_0 : i32, i32
  }
  func.func @transform_3(%arg0: i32) -> (i32, i32) {
    %c0_i32 = arith.constant 0 : i32
    %c0_i32_0 = arith.constant 0 : i32
    return %arg0, %c0_i32 : i32, i32
  }
}

</mosaic_0001>

<bundles_post_ra>
// kernel: tpu_custom_call.1
= control target key start
LH: loop header
LB: loop body
LE: loop exit
PB: predicated region body
PF: predicated region fallthrough
CT: control target
= control target key end

     0   :  { %8 = vsyncpa [#allocation3], 0  ;;  %s264_s0 = inlined_call_operand.hbm [shape: f32[24,32], index: 0, kind: input, shape index: {}]   ;;  %s265_s1 = inlined_call_operand.hbm [shape: f32[32,32], index: 1, kind: input, shape index: {}]   ;;  %s266_s2 = inlined_call_operand.vmem [shape: f32[1,32], index: 2, kind: input, shape index: {}]   ;;  %s267_s3 = inlined_call_operand.hbm [shape: f32[24,32], index: 3, kind: output, shape index: {}]  }
   0x1   :  { %9 = vsyncpa [#allocation6], 0 }
   0x2   :  { %10 = vsyncpa [#allocation4], 0  ;;  %s15_s14 = sshll.u32 %s264_s0, 4  ;;  %s212_s15 = smov [#allocation2]   ;;  %s16_s14 = int_to_ptr.hbm [resolvable:$true] %s15_s14 }
   0x3   :  { %s17_s16 = sshll.u32 %s212_s15, 4  ;;  %s28_s19 = sshll.u32 %s265_s1, 4  ;;  %s18_s16 = int_to_ptr.vmem [resolvable:$true] %s17_s16  ;;  %s29_s19 = int_to_ptr.hbm [resolvable:$true] %s28_s19 }
   0x4   :  { %s213_s20 = smov 128   ;;  %s214_s21 = smov 8  }
   0x5   :  { %23 = dma.hbm_to_vmem [thread:$0]  %s16_s14, 384, %s18_s16, [#allocation3], %s213_s20, %s213_s20, %s214_s21  }
   0x6   :  { %s215_s22 = smov [#allocation5]  }
   0x7   :  { %s30_s23 = sshll.u32 %s215_s22, 4  ;;  %s31_s23 = int_to_ptr.vmem [resolvable:$true] %s30_s23 }
   0x8   :  { %36 = dma.hbm_to_vmem [thread:$0]  %s29_s19, 512, %s31_s23, [#allocation6], %s213_s20, %s213_s20, %s214_s21  }
   0x9   :  { %206 = dma.done.wait [#allocation3], 384  }
   0xa   :  { %207 = vsyncadd [#allocation3], 4294966912 }
   0xb   :  { %208 = dma.done.wait [#allocation6], 512  }
   0xc   :  { %209 = vsyncadd [#allocation6], 4294966784  ;;  %v53_v0 = vld [vmem:[#allocation5 + $0x18] sm:$0xff]  ;;  %v52_v1 = vld [vmem:[#allocation5 + $0x10] sm:$0xff]  ;;  %vm58_vm0 = vcmask 261120   ;;  %s216_s24 = smov [#allocation7]  }
   0xd   :  { %121 = vmatpush.msra.mxu2 %v53_v0  ;;  %80 = vmatpush.msra.mxu0 %v53_v0  ;;  %v51_v2 = vld [vmem:[#allocation5 + $0x8] sm:$0xff]  ;;  %v50_v3 = vld [vmem:[#allocation5] sm:$0xff]  ;;  %v49_v4 = vld [vmem:[#allocation2 + $0x10] sm:$0xff]  ;;  %s101_s25 = sshll.u32 %s216_s24, 4  ;;  %s103_s28 = sshll.u32 %s267_s3, 4  ;;  %s102_s25 = int_to_ptr.vmem [resolvable:$true] %s101_s25  ;;  %s104_s28 = int_to_ptr.hbm [resolvable:$true] %s103_s28 }
   0xe   :  { %120 = vmatpush.msra.mxu1 %v53_v0  ;;  %v47_v5 = vld [vmem:[#allocation2] sm:$0xff]  ;;  %v48_v6 = vld [vmem:[#allocation2 + $0x8] sm:$0xff] }
   0xf   :  { %123 = vmatpush.msra.mxu2 %v52_v1  ;;  %81 = vmatpush.msra.mxu0 %v52_v1  ;;  %v133_v7 = vld [vmem:[%s266_s2] ss:$0 sm:$0xff] }
  0x10   :  { %122 = vmatpush.msra.mxu1 %v52_v1 }
  0x11   :  { %125 = vmatpush.msra.mxu2 %v51_v2  ;;  %82 = vmatpush.msra.mxu0 %v51_v2 }
  0x12   :  { %124 = vmatpush.msra.mxu1 %v51_v2 }
  0x13   :  { %127 = vmatpush.msra.mxu2 %v50_v3  ;;  %83 = vmatpush.msra.mxu0 %v50_v3 }
  0x14   :  { %119 = vmatmul.msk.f32.vlgmr.msra.gmra.mxu2 %vm58_vm0, %v49_v4  ;;  %126 = vmatpush.msra.mxu1 %v50_v3 }
  0x15   :  { %117 = vmatmul.msk.f32.vlgmr.msra.gmra.mxu0 %vm58_vm0, %v47_v5  ;;  %118 = vmatmul.msk.f32.vlgmr.msra.gmra.mxu1 %vm58_vm0, %v48_v6 }
  0x92   :  { %v85_v8 = vpop.f32.mrf.mxu0  ;;  %v88_v9 = vpop.f32.mrf.mxu1 }
  0x93   :  { %v86_v10 = vadd.f32 %v133_v7, %v85_v8  ;;  %v89_v11 = vadd.f32 %v133_v7, %v88_v9 }
  0x95   :  { %94 = vst.msk [vmem:[#allocation7] sm:$0xff] %vm58_vm0, %v86_v10 }
  0x96   :  { %95 = vst.msk [vmem:[#allocation7 + $0x8] sm:$0xff] %vm58_vm0, %v89_v11 }
  0x97   :  { %v91_v12 = vpop.f32.mrf.mxu2 }
  0x98   :  { %v92_v13 = vadd.f32 %v133_v7, %v91_v12 }
  0x9a   :  { %96 = vst.msk [vmem:[#allocation7 + $0x10] sm:$0xff] %vm58_vm0, %v92_v13 }
  0x9b   :  { %109 = dma.vmem_to_hbm [thread:$0]  %s102_s25, 384, %s104_s28, [#allocation4], %s213_s20, %s213_s20, %s214_s21  }
  0x9c   :  { %210 = dma.done.wait [#allocation4], 384  }
  0x9d   :  { %211 = vsyncadd [#allocation4], 4294966912 }
  0x9e   :  { %114 = vsyncpa [#allocation3], 1 }
  0x9f   :  { %115 = vsyncpa [#allocation6], 1 }
  0xa0   :  { %116 = vsyncpa [#allocation4], 1 }

</bundles_post_ra>
